<compile_context>
chip_gen: v7x
topology: tpu7x:2x2x1
jax: 0.10.0
libtpu: 0.0.40
codegen_flags: <defaults>
</compile_context>

<pallas_src>
import functools

import jax
import jax.numpy as jnp
from jax import lax
from jax.experimental import pallas as pl
from jax.experimental.pallas import tpu as pltpu


def _round_up(x, m):
    return ((x + m - 1) // m) * m


def _sepconv_kernel(x_ref, wf_ref, mask_ref, out_ref, *,
                    W, HW_in, HW_out, KH, KW, pad, dil, Cin, bt, Lbuf):
    """Fused depthwise(KxK) + pointwise(1x1) conv for one batch tile.

    x_ref    : (bt, Cin, H*W)            lane-dense channel-major input
    wf_ref   : (Cout, KH*KW*Cin)         fused weights, row index = t*Cin + ci
    mask_ref : (KW, H_out*W_out)         per-tap column-validity masks (W edges)
    out_ref  : (bt, Cout, H_out*W_out)   lane-dense channel-major output
    """
    F = pad * (W + 1)           # leading zeros: `pad` cols + `pad` zero rows
    tail = Lbuf - F - HW_in     # trailing zeros: bottom pad rows + alignment
    dt = x_ref.dtype

    # Hoisted constants / broadcasts (JAX does not CSE broadcast_in_dim).
    zfront = jnp.zeros((Cin, F), dt) if F > 0 else None
    ztail = jnp.zeros((Cin, tail), dt) if tail > 0 else None
    mask_b = {}
    for j in range(KW):
        if j * dil != pad:      # dj = j*dil - pad != 0 -> W-edge masking needed
            mask_b[j] = jnp.broadcast_to(mask_ref[j:j + 1, :], (Cin, HW_out))

    rhs_cols = []
    for b in range(bt):
        xf = x_ref[b]                                        # (Cin, H*W)
        pieces = []
        if zfront is not None:
            pieces.append(zfront)
        pieces.append(xf)
        if ztail is not None:
            pieces.append(ztail)
        # H-padded, row-flattened image as a value (no scratch stores).
        xbuf = jnp.concatenate(pieces, axis=1) if len(pieces) > 1 else xf

        taps = []
        for i in range(KH):
            for j in range(KW):
                st = dil * (i * W + j)                       # static lane offset
                tap = xbuf[:, st:st + HW_out]                # (Cin, HW_out)
                if j * dil != pad:
                    tap = tap * mask_b[j]                    # zero W-edge wraps
                taps.append(tap)
        # im2col block for this image: rows ordered t*Cin + ci (sublane concat).
        rhs_cols.append(jnp.concatenate(taps, axis=0))       # (KH*KW*Cin, HW_out)

    # Batch images side by side on the lane axis -> one big MXU matmul.
    rhs = jnp.concatenate(rhs_cols, axis=1) if bt > 1 else rhs_cols[0]
    out = jnp.dot(wf_ref[...], rhs,
                  preferred_element_type=jnp.float32)        # (Cout, bt*HW_out)

    for b in range(bt):
        out_ref[b] = out[:, b * HW_out:(b + 1) * HW_out].astype(out_ref.dtype)


def separable_conv2d(x_nchw, w_dw, w_pw, *, kernel_size, stride=1, padding=0,
                     dilation=1, batch_tile=None):
    """Forward of SeparableConv2d (bias=False).

    x_nchw: (N, Cin, H, W); w_dw: (Cin, 1, K, K) depthwise weight (groups=Cin);
    w_pw: (Cout, Cin, 1, 1) pointwise weight.
    """
    assert stride == 1, "TODO(synk): strided depthwise not implemented"
    N, Cin, H, W = x_nchw.shape
    Cout = w_pw.shape[0]
    KH = KW = kernel_size
    KT = KH * KW

    H_out = H + 2 * padding - dilation * (KH - 1)
    W_out = W + 2 * padding - dilation * (KW - 1)
    assert H_out == H and W_out == W, \
        "TODO(synk): non-'same' conv geometry (needs crop path)"

    HW_in = H * W
    HW_out = H_out * W_out
    bt = N if batch_tile is None else batch_tile   # whole toy batch in 1 step
    assert N % bt == 0

    dt = x_nchw.dtype

    # Fused depthwise+pointwise weight: wf[o, t*Cin + c] = wpw[o, c] * wdw[c, t].
    wdw2 = w_dw.reshape(Cin, KT).astype(jnp.float32)
    wpw2 = w_pw.reshape(Cout, Cin).astype(jnp.float32)
    wf = jnp.einsum("oc,ct->otc", wpw2, wdw2).reshape(Cout, KT * Cin)
    # MXU operands follow the activation dtype (bf16 in -> bf16 operands with
    # f32 accumulate on v6e/v7x); f32 inputs stay exact f32.
    wf = wf.astype(dt)

    # Per-tap column-validity masks (W-edge handling; depend only on j).
    col = jnp.arange(HW_out, dtype=jnp.int32) % W_out
    dj = jnp.arange(KW, dtype=jnp.int32) * dilation - padding
    masks = ((col[None, :] + dj[:, None] >= 0)
             & (col[None, :] + dj[:, None] < W)).astype(dt)      # (KW, HW_out)

    # Flat H-padded buffer length (lead pad + image + bottom pad + slack).
    F = padding * (W + 1)
    Lbuf = _round_up(F + HW_in + padding * W + padding, 128)

    x_flat = x_nchw.reshape(N, Cin, HW_in)   # free reshape of contiguous NCHW

    kernel = functools.partial(
        _sepconv_kernel, W=W, HW_in=HW_in, HW_out=HW_out, KH=KH, KW=KW,
        pad=padding, dil=dilation, Cin=Cin, bt=bt, Lbuf=Lbuf)

    out_flat = pl.pallas_call(
        kernel,
        out_shape=jax.ShapeDtypeStruct((N, Cout, HW_out), dt),
        grid_spec=pltpu.PrefetchScalarGridSpec(
            num_scalar_prefetch=0,
            grid=(N // bt,),
            in_specs=[
                pl.BlockSpec((bt, Cin, HW_in), lambda n: (n, 0, 0)),
                pl.BlockSpec((Cout, KT * Cin), lambda n: (0, 0)),
                pl.BlockSpec((KW, HW_out), lambda n: (0, 0)),
            ],
            out_specs=pl.BlockSpec((bt, Cout, HW_out), lambda n: (n, 0, 0)),
        ),
        compiler_params=pltpu.CompilerParams(
            dimension_semantics=("parallel",)),
    )(x_flat, wf, masks)

    # Metadata-only reshape back to NCHW (contiguous split of the last dim).
    return out_flat.reshape(N, Cout, H_out, W_out)


def _reference(x_nchw, w_dw, w_pw, *, padding, dilation):
    # Pure-JAX reference matching PyTorch Conv2d semantics.
    Cin = x_nchw.shape[1]
    dn = ("NCHW", "OIHW", "NCHW")
    dw = lax.conv_general_dilated(
        x_nchw, w_dw, window_strides=(1, 1),
        padding=((padding, padding), (padding, padding)),
        rhs_dilation=(dilation, dilation),
        dimension_numbers=dn, feature_group_count=Cin)
    return lax.conv_general_dilated(
        dw, w_pw, window_strides=(1, 1), padding=((0, 0), (0, 0)),
        dimension_numbers=dn)


if __name__ == "__main__":
    # Module instance: SeparableConv2d(in_channels=8, out_channels=16,
    #                                  kernel_size=3, stride=1, padding=1,
    #                                  dilation=1, bias=False)
    N, Cin, H, W = 2, 8, 16, 16
    Cout, K, PAD, DIL = 16, 3, 1, 1

    key = jax.random.PRNGKey(0)
    kx, kdw, kpw = jax.random.split(key, 3)
    x = jax.random.normal(kx, (N, Cin, H, W), dtype=jnp.float32)
    # PyTorch parameter shapes: conv1.weight (Cin, 1, K, K),
    # pointwise.weight (Cout, Cin, 1, 1); deterministic synthetic init.
    w_dw = jax.random.normal(kdw, (Cin, 1, K, K), dtype=jnp.float32) * 0.1
    w_pw = jax.random.normal(kpw, (Cout, Cin, 1, 1), dtype=jnp.float32) * 0.1

    out = separable_conv2d(x, w_dw, w_pw, kernel_size=K, padding=PAD,
                           dilation=DIL, stride=1)
    out = jax.block_until_ready(out)

    ref = _reference(x, w_dw, w_pw, padding=PAD, dilation=DIL)
    assert out.shape == ref.shape == (N, Cout, H, W)
    assert jnp.allclose(out, ref, atol=1e-4, rtol=1e-4)

    print("KERNEL_OK")
</pallas_src>

<mosaic_0001>
module attributes {stable_mosaic.version = 11 : i64} {
  func.func @_sepconv_kernel(%arg0: i32, %arg1: memref<2x8x256xf32, #tpu.memory_space<vmem>>, %arg2: memref<16x72xf32, #tpu.memory_space<vmem>>, %arg3: memref<3x256xf32, #tpu.memory_space<vmem>>, %arg4: memref<2x16x256xf32, #tpu.memory_space<vmem>>) attributes {dimension_semantics = [#tpu.dimension_semantics<parallel>], iteration_bounds = array<i64: 1>, scalar_prefetch = 0 : i64, scratch_operands = 0 : i64, tpu.core_type = #tpu.core_type<tc>, window_params = [{transform_indices = @transform_0, window_bounds = array<i64: 2, 8, 256>}, {pipeline_mode = #tpu.pipeline_mode<synchronous>, transform_indices = @transform_1, window_bounds = array<i64: 16, 72>}, {pipeline_mode = #tpu.pipeline_mode<synchronous>, transform_indices = @transform_2, window_bounds = array<i64: 3, 256>}, {transform_indices = @transform_3, window_bounds = array<i64: 2, 16, 256>}]} {
    %cst = arith.constant 0.000000e+00 : f32
    %0 = vector.broadcast %cst : f32 to vector<8x17xf32>
    %cst_0 = arith.constant 0.000000e+00 : f32
    %1 = vector.broadcast %cst_0 : f32 to vector<8x111xf32>
    %c0 = arith.constant 0 : index
    %c0_1 = arith.constant 0 : index
    %2 = vector.load %arg3[%c0, %c0_1] : memref<3x256xf32, #tpu.memory_space<vmem>>, vector<1x256xf32>
    %3 = vector.shape_cast %2 : vector<1x256xf32> to vector<1x256xf32>
    %4 = vector.broadcast %3 : vector<1x256xf32> to vector<8x256xf32>
    %c2 = arith.constant 2 : index
    %c0_2 = arith.constant 0 : index
    %5 = vector.load %arg3[%c2, %c0_2] : memref<3x256xf32, #tpu.memory_space<vmem>>, vector<1x256xf32>
    %6 = vector.shape_cast %5 : vector<1x256xf32> to vector<1x256xf32>
    %7 = vector.broadcast %6 : vector<1x256xf32> to vector<8x256xf32>
    %c0_3 = arith.constant 0 : index
    %c0_4 = arith.constant 0 : index
    %c0_5 = arith.constant 0 : index
    %8 = vector.load %arg1[%c0_3, %c0_4, %c0_5] : memref<2x8x256xf32, #tpu.memory_space<vmem>>, vector<1x8x256xf32>
    %9 = vector.shape_cast %8 : vector<1x8x256xf32> to vector<8x256xf32>
    %10 = tpu.concatenate %0, %9, %1 in 1 : vector<8x17xf32>, vector<8x256xf32>, vector<8x111xf32> -> vector<8x384xf32>
    %11 = vector.extract_strided_slice %10 {offsets = [0, 0], sizes = [8, 256], strides = [1, 1]} : vector<8x384xf32> to vector<8x256xf32>
    %12 = arith.mulf %11, %4 : vector<8x256xf32>
    %13 = vector.extract_strided_slice %10 {offsets = [0, 1], sizes = [8, 256], strides = [1, 1]} : vector<8x384xf32> to vector<8x256xf32>
    %14 = vector.extract_strided_slice %10 {offsets = [0, 2], sizes = [8, 256], strides = [1, 1]} : vector<8x384xf32> to vector<8x256xf32>
    %15 = arith.mulf %14, %7 : vector<8x256xf32>
    %16 = vector.extract_strided_slice %10 {offsets = [0, 16], sizes = [8, 256], strides = [1, 1]} : vector<8x384xf32> to vector<8x256xf32>
    %17 = arith.mulf %16, %4 : vector<8x256xf32>
    %18 = vector.extract_strided_slice %10 {offsets = [0, 17], sizes = [8, 256], strides = [1, 1]} : vector<8x384xf32> to vector<8x256xf32>
    %19 = vector.extract_strided_slice %10 {offsets = [0, 18], sizes = [8, 256], strides = [1, 1]} : vector<8x384xf32> to vector<8x256xf32>
    %20 = arith.mulf %19, %7 : vector<8x256xf32>
    %21 = vector.extract_strided_slice %10 {offsets = [0, 32], sizes = [8, 256], strides = [1, 1]} : vector<8x384xf32> to vector<8x256xf32>
    %22 = arith.mulf %21, %4 : vector<8x256xf32>
    %23 = vector.extract_strided_slice %10 {offsets = [0, 33], sizes = [8, 256], strides = [1, 1]} : vector<8x384xf32> to vector<8x256xf32>
    %24 = vector.extract_strided_slice %10 {offsets = [0, 34], sizes = [8, 256], strides = [1, 1]} : vector<8x384xf32> to vector<8x256xf32>
    %25 = arith.mulf %24, %7 : vector<8x256xf32>
    %26 = tpu.concatenate %12, %13, %15, %17, %18, %20, %22, %23, %25 in 0 : vector<8x256xf32>, vector<8x256xf32>, vector<8x256xf32>, vector<8x256xf32>, vector<8x256xf32>, vector<8x256xf32>, vector<8x256xf32>, vector<8x256xf32>, vector<8x256xf32> -> vector<72x256xf32>
    %c1 = arith.constant 1 : index
    %c0_6 = arith.constant 0 : index
    %c0_7 = arith.constant 0 : index
    %27 = vector.load %arg1[%c1, %c0_6, %c0_7] : memref<2x8x256xf32, #tpu.memory_space<vmem>>, vector<1x8x256xf32>
    %28 = vector.shape_cast %27 : vector<1x8x256xf32> to vector<8x256xf32>
    %29 = tpu.concatenate %0, %28, %1 in 1 : vector<8x17xf32>, vector<8x256xf32>, vector<8x111xf32> -> vector<8x384xf32>
    %30 = vector.extract_strided_slice %29 {offsets = [0, 0], sizes = [8, 256], strides = [1, 1]} : vector<8x384xf32> to vector<8x256xf32>
    %31 = arith.mulf %30, %4 : vector<8x256xf32>
    %32 = vector.extract_strided_slice %29 {offsets = [0, 1], sizes = [8, 256], strides = [1, 1]} : vector<8x384xf32> to vector<8x256xf32>
    %33 = vector.extract_strided_slice %29 {offsets = [0, 2], sizes = [8, 256], strides = [1, 1]} : vector<8x384xf32> to vector<8x256xf32>
    %34 = arith.mulf %33, %7 : vector<8x256xf32>
    %35 = vector.extract_strided_slice %29 {offsets = [0, 16], sizes = [8, 256], strides = [1, 1]} : vector<8x384xf32> to vector<8x256xf32>
    %36 = arith.mulf %35, %4 : vector<8x256xf32>
    %37 = vector.extract_strided_slice %29 {offsets = [0, 17], sizes = [8, 256], strides = [1, 1]} : vector<8x384xf32> to vector<8x256xf32>
    %38 = vector.extract_strided_slice %29 {offsets = [0, 18], sizes = [8, 256], strides = [1, 1]} : vector<8x384xf32> to vector<8x256xf32>
    %39 = arith.mulf %38, %7 : vector<8x256xf32>
    %40 = vector.extract_strided_slice %29 {offsets = [0, 32], sizes = [8, 256], strides = [1, 1]} : vector<8x384xf32> to vector<8x256xf32>
    %41 = arith.mulf %40, %4 : vector<8x256xf32>
    %42 = vector.extract_strided_slice %29 {offsets = [0, 33], sizes = [8, 256], strides = [1, 1]} : vector<8x384xf32> to vector<8x256xf32>
    %43 = vector.extract_strided_slice %29 {offsets = [0, 34], sizes = [8, 256], strides = [1, 1]} : vector<8x384xf32> to vector<8x256xf32>
    %44 = arith.mulf %43, %7 : vector<8x256xf32>
    %45 = tpu.concatenate %31, %32, %34, %36, %37, %39, %41, %42, %44 in 0 : vector<8x256xf32>, vector<8x256xf32>, vector<8x256xf32>, vector<8x256xf32>, vector<8x256xf32>, vector<8x256xf32>, vector<8x256xf32>, vector<8x256xf32>, vector<8x256xf32> -> vector<72x256xf32>
    %46 = tpu.concatenate %26, %45 in 1 : vector<72x256xf32>, vector<72x256xf32> -> vector<72x512xf32>
    %c0_8 = arith.constant 0 : index
    %c0_9 = arith.constant 0 : index
    %47 = vector.load %arg2[%c0_8, %c0_9] : memref<16x72xf32, #tpu.memory_space<vmem>>, vector<16x72xf32>
    %cst_10 = arith.constant dense<0.000000e+00> : vector<16x512xf32>
    %48 = tpu.matmul %47, %46, %cst_10 {dimension_numbers = #tpu.dot_dimension_numbers<[1], [0], [0], [1], [0, 0, 1, 1], [], []>} : vector<16x72xf32>, vector<72x512xf32>, vector<16x512xf32> -> vector<16x512xf32>
    %49 = vector.extract_strided_slice %48 {offsets = [0, 0], sizes = [16, 256], strides = [1, 1]} : vector<16x512xf32> to vector<16x256xf32>
    %c0_11 = arith.constant 0 : index
    %c0_12 = arith.constant 0 : index
    %c0_13 = arith.constant 0 : index
    %50 = vector.load %arg4[%c0_11, %c0_12, %c0_13] : memref<2x16x256xf32, #tpu.memory_space<vmem>>, vector<1x16x256xf32>
    %51 = vector.shape_cast %50 : vector<1x16x256xf32> to vector<16x256xf32>
    %52 = vector.shape_cast %49 : vector<16x256xf32> to vector<1x16x256xf32>
    tpu.vector_store %arg4[%c0_11, %c0_12, %c0_13], %52 {strides = array<i32>} : memref<2x16x256xf32, #tpu.memory_space<vmem>>, vector<1x16x256xf32>,
    %53 = vector.extract_strided_slice %48 {offsets = [0, 256], sizes = [16, 256], strides = [1, 1]} : vector<16x512xf32> to vector<16x256xf32>
    %c1_14 = arith.constant 1 : index
    %c0_15 = arith.constant 0 : index
    %c0_16 = arith.constant 0 : index
    %54 = vector.load %arg4[%c1_14, %c0_15, %c0_16] : memref<2x16x256xf32, #tpu.memory_space<vmem>>, vector<1x16x256xf32>
    %55 = vector.shape_cast %54 : vector<1x16x256xf32> to vector<16x256xf32>
    %56 = vector.shape_cast %53 : vector<16x256xf32> to vector<1x16x256xf32>
    tpu.vector_store %arg4[%c1_14, %c0_15, %c0_16], %56 {strides = array<i32>} : memref<2x16x256xf32, #tpu.memory_space<vmem>>, vector<1x16x256xf32>,
    return
  }
  func.func @transform_0(%arg0: i32) -> (i32, i32, i32) {
    %c0_i32 = arith.constant 0 : i32
    %c0_i32_0 = arith.constant 0 : i32
    %c0_i32_1 = arith.constant 0 : i32
    return %arg0, %c0_i32, %c0_i32_0 : i32, i32, i32
  }
  func.func @transform_1(%arg0: i32) -> (i32, i32) {
    %c0_i32 = arith.constant 0 : i32
    %c0_i32_0 = arith.constant 0 : i32
    %c0_i32_1 = arith.constant 0 : i32
    return %c0_i32, %c0_i32_0 : i32, i32
  }
  func.func @transform_2(%arg0: i32) -> (i32, i32) {
    %c0_i32 = arith.constant 0 : i32
    %c0_i32_0 = arith.constant 0 : i32
    %c0_i32_1 = arith.constant 0 : i32
    return %c0_i32, %c0_i32_0 : i32, i32
  }
  func.func @transform_3(%arg0: i32) -> (i32, i32, i32) {
    %c0_i32 = arith.constant 0 : i32
    %c0_i32_0 = arith.constant 0 : i32
    %c0_i32_1 = arith.constant 0 : i32
    return %arg0, %c0_i32, %c0_i32_0 : i32, i32, i32
  }
}

</mosaic_0001>

<bundles_post_ra>
// kernel: tpu_custom_call.1
= control target key start
LH: loop header
LB: loop body
LE: loop exit
PB: predicated region body
PF: predicated region fallthrough
CT: control target
= control target key end

     0   :  { %8 = vsyncpa [#allocation3], 0  ;;  %s1081_s0 = inlined_call_operand.hbm [shape: f32[2,8,256], index: 0, kind: input, shape index: {}]   ;;  %s1082_s1 = inlined_call_operand.hbm [shape: f32[16,72], index: 1, kind: input, shape index: {}]   ;;  %s1083_s2 = inlined_call_operand.hbm [shape: f32[3,256], index: 2, kind: input, shape index: {}]   ;;  %s1084_s3 = inlined_call_operand.hbm [shape: f32[2,16,256], index: 3, kind: output, shape index: {}]  }
   0x1   :  { %9 = vsyncpa [#allocation6], 0 }
   0x2   :  { %10 = vsyncpa [#allocation4], 0  ;;  %s835_s12 = smov [#allocation5]   ;;  %s741_s16 = scalar_lea.hbm %s1082_s1, 256 }
   0x3   :  { %s28_s13 = sshll.u32 %s835_s12, 4  ;;  %p742_p0 = scmp.ne.s32.totalorder %s1082_s1, %s741_s16  ;;  %s29_s13 = int_to_ptr.vmem [resolvable:$true] %s28_s13 }
   0x4   :  { %p745_p1 = scmp.lt.u32.totalorder %s741_s16, %s1082_s1 }
   0x6   :  { %p747_p2 = pnand %p745_p1, %p742_p0 }
   0x8   :  { %750 = shalt.err (!%p747_p2)
}
   0x9   :  { %s751_s21 = scalar_lea.vmem %s29_s13, 256  ;;  %p756_p4 = scmp.lt.s32.totalorder %s29_s13, %s29_s13 }
   0xa   :  { %p752_p3 = scmp.ne.s32.totalorder %s29_s13, %s751_s21  ;;  %p757_p5 = scmp.lt.s32.totalorder %s751_s21, %s751_s21 }
   0xc   :  { %p758_p6 = por %p757_p5, %p756_p4 }
   0xe   :  { %p759_p7 = pnand %p758_p6, %p752_p3 }
  0x10   :  { %762 = shalt.err (!%p759_p7)
}
  0x11   :  { %s836_s22 = smov 128   ;;  %s837_s23 = smov 8  }
  0x12   :  { %34 = dma.hbm_to_vmem [thread:$0]  %s1082_s1, 256, %s29_s13, [#allocation6], %s836_s22, %s836_s22, %s837_s23  }
  0x13   :  { %s838_s26 = smov [#allocation2]   ;;  %s763_s30 = scalar_lea.hbm %s1081_s0, 512 }
  0x14   :  { %s16_s27 = sshll.u32 %s838_s26, 4  ;;  %p764_p8 = scmp.ne.s32.totalorder %s1081_s0, %s763_s30  ;;  %s17_s27 = int_to_ptr.vmem [resolvable:$true] %s16_s27 }
  0x15   :  { %p767_p9 = scmp.lt.u32.totalorder %s763_s30, %s1081_s0 }
  0x17   :  { %p769_p10 = pnand %p767_p9, %p764_p8 }
  0x19   :  { %772 = shalt.err (!%p769_p10)
}
  0x1a   :  { %s773_s8 = scalar_lea.vmem %s17_s27, 512  ;;  %p778_p12 = scmp.lt.s32.totalorder %s17_s27, %s17_s27 }
  0x1b   :  { %p774_p11 = scmp.ne.s32.totalorder %s17_s27, %s773_s8  ;;  %p779_p13 = scmp.lt.s32.totalorder %s773_s8, %s773_s8 }
  0x1d   :  { %p780_p0 = por %p779_p13, %p778_p12 }
  0x1f   :  { %p781_p1 = pnand %p780_p0, %p774_p11 }
  0x21   :  { %784 = shalt.err (!%p781_p1)
}
  0x22   :  { %s839_s1 = smov 256   ;;  %s840_s9 = smov 16  }
  0x23   :  { %22 = dma.hbm_to_vmem [thread:$0]  %s1081_s0, 512, %s17_s27, [#allocation3], %s839_s1, %s839_s1, %s840_s9  }
  0x24   :  { %s841_s12 = smov [#allocation7]   ;;  %s785_s16 = scalar_lea.hbm %s1083_s2, 128 }
  0x25   :  { %s41_s13 = sshll.u32 %s841_s12, 4  ;;  %p786_p2 = scmp.ne.s32.totalorder %s1083_s2, %s785_s16  ;;  %s42_s13 = int_to_ptr.vmem [resolvable:$true] %s41_s13 }
  0x26   :  { %p789_p3 = scmp.lt.u32.totalorder %s785_s16, %s1083_s2 }
  0x28   :  { %p791_p4 = pnand %p789_p3, %p786_p2 }
  0x2a   :  { %794 = shalt.err (!%p791_p4)
}
  0x2b   :  { %s795_s21 = scalar_lea.vmem %s42_s13, 128  ;;  %p800_p6 = scmp.lt.s32.totalorder %s42_s13, %s42_s13 }
  0x2c   :  { %p796_p5 = scmp.ne.s32.totalorder %s42_s13, %s795_s21  ;;  %p801_p7 = scmp.lt.s32.totalorder %s795_s21, %s795_s21 }
  0x2e   :  { %p802_p8 = por %p801_p7, %p800_p6 }
  0x30   :  { %p803_p9 = pnand %p802_p8, %p796_p5 }
  0x32   :  { %806 = shalt.err (!%p803_p9)
}
  0x33   :  { %44 = dma.hbm_to_vmem [thread:$0]  %s1083_s2, 128, %s42_s13, [#allocation6]  }
  0x34   :  { %829 = dma.done.wait [#allocation3], 512  }
  0x35   :  { %830 = vsyncadd [#allocation3], 4294966784 }
  0x36   :  { %831 = dma.done.wait [#allocation6], 384  }
  0x37   :  { %832 = vsyncadd [#allocation6], 4294966912  ;;  %v56_v0 = vlaneseq  ;;  %v260_v2 = vld [vmem:[#allocation2 + $0x10] sm:$0xff]  ;;  %v77_v3 = vld [vmem:[#allocation2] sm:$0xff]  ;;  %s842_s23 = smov 17   ;;  %s843_s2 = smov 2  }
  0x38   :  { %264 = vrot.lane.b32.xlu1 %v260_v2, %s842_s23  ;;  %81 = vrot.lane.b32.xlu0 %v77_v3, %s842_s23  ;;  %v261_v6 = vld [vmem:[#allocation2 + $0x18] sm:$0xff]  ;;  %v78_v7 = vld [vmem:[#allocation2 + $0x8] sm:$0xff]  ;;  %v67_v8 = vld [vmem:[#allocation7 + $0x2] ss:$4 sm:$0x3]  ;;  %s844_s24 = smov 18  }
  0x39   :  { %v57_v1 = vshrl.u32 %v56_v0, 7  ;;  %v54_v11 = vld [vmem:[#allocation7] ss:$4 sm:$0x3]  ;;  %s845_s25 = smov 32   ;;  %s846_s26 = smov 34  }
  0x3a   :  { %vm85_vm0 = vcmask 138240   ;;  %s847_s27 = smov 127   ;;  %s848_s28 = smov 111   ;;  %vm98_vm1 = vcmask 15360   ;;  %vm110_vm2 = vcmask 130048   ;;  %vm134_vm3 = vcmask 261120  }
  0x3b   :  { %v62_v4 = vsub.s32 1, %v57_v1  ;;  %v58_v5 = vsub.s32 0, %v57_v1  ;;  %s849_s29 = smov 95   ;;  %s850_s30 = smov 126   ;;  %vm122_vm4 = vcmask 146432   ;;  %vm146_vm5 = vcmask 277504  }
  0x3c   :  { %266 = vrot.lane.b32.xlu1 %v261_v6, %s842_s23  ;;  %83 = vrot.lane.b32.xlu0 %v78_v7, %s842_s23  ;;  %s851_s4 = smov 112   ;;  %s852_s5 = smov 96   ;;  %vm162_vm6 = vcmask 1039360   ;;  %vm176_vm7 = vcmask 1031168   ;;  %vm201_vm8 = vcmask 908288   ;;  %vm190_vm9 = vcmask 916480  }
  0x3d   :  { %v76_v9 = vrot.slane %v67_v8, %v62_v4  ;;  %v72_v10 = vrot.slane %v67_v8, %v58_v5  ;;  %v916_v12 = vrot.slane %v54_v11, %v62_v4  ;;  %v918_v13 = vrot.slane %v54_v11, %v58_v5  ;;  %s853_s6 = smov 110   ;;  %s855_s7 = smov 94  }
  0x3e   :  { %vm229_vm10 = vcmask 785408   ;;  %vm240_vm11 = vcmask 777216   ;;  %vm215_vm12 = vcmask 900096   ;;  %vm254_vm13 = vcmask 769024   ;;  %s856_s8 = smov [#allocation8]  }
  0x3f   :  { %vm390_vm14 = vcmask 588800   ;;  %s565_s10 = sshll.u32 %s856_s8, 4  ;;  %s566_s10 = int_to_ptr.vmem [resolvable:$true] %s565_s10 }
  0x40   :  { %96 = vrot.lane.b32.xlu1 %v76_v9, %s843_s2  ;;  %94 = vrot.lane.b32.xlu0 %v72_v10, %s843_s2  ;;  %s807_s11 = scalar_lea.vmem %s566_s10, 1024  ;;  %p812_p11 = scmp.lt.s32.totalorder %s566_s10, %s566_s10 }
  0x41   :  { %p808_p10 = scmp.ne.s32.totalorder %s566_s10, %s807_s11  ;;  %p813_p12 = scmp.lt.s32.totalorder %s807_s11, %s807_s11 }
  0x43   :  { %p814_p13 = por %p813_p12, %p812_p11 }
  0x44   :  { %108 = vrot.lane.b32.xlu1 %v916_v12, %s840_s9  ;;  %106 = vrot.lane.b32.xlu0 %v918_v13, %s840_s9 }
  0x45   :  { %p815_p0 = pnand %p814_p13, %p808_p10 }
  0x48   :  { %120 = vrot.lane.b32.xlu1 %v76_v9, %s844_s24  ;;  %118 = vrot.lane.b32.xlu0 %v72_v10, %s844_s24 }
  0x4c   :  { %132 = vrot.lane.b32.xlu1 %v916_v12, %s845_s25  ;;  %130 = vrot.lane.b32.xlu0 %v918_v13, %s845_s25 }
  0x50   :  { %144 = vrot.lane.b32.xlu1 %v76_v9, %s846_s26  ;;  %142 = vrot.lane.b32.xlu0 %v72_v10, %s846_s26 }
  0xaa   :  { %v265_v14 = vpop.permute.xlu1 %264  ;;  %v82_v15 = vpop.permute.xlu0 %81 }
  0xab   :  { %v938_v24 = vsel %vm85_vm0, 0.0, %v265_v14  ;;  %v940_v25 = vsel %vm85_vm0, 0.0, %v82_v15 }
  0xac   :  { %v646_v28 = vpack.i.bf16 %v938_v24, %v940_v25 }
  0xae   :  { %v267_v16 = vpop.permute.xlu1 %266  ;;  %v84_v17 = vpop.permute.xlu0 %83 }
  0xaf   :  { %v926_v18 = vsel %vm85_vm0, %v265_v14, %v267_v16  ;;  %v928_v19 = vsel %vm85_vm0, %v267_v16, 0.0  ;;  %v930_v20 = vsel %vm85_vm0, %v82_v15, %v84_v17  ;;  %v932_v21 = vsel %vm85_vm0, %v84_v17, 0.0 }
  0xb0   :  { %v641_v22 = vpack.i.bf16 %v928_v19, %v926_v18  ;;  %v636_v23 = vpack.i.bf16 %v932_v21, %v930_v20  ;;  %v854_v17 = vmov 0.0  }
  0xb1   :  { %461 = vmatprep.mubr.f32.mxu0 %v854_v17  ;;  %538 = vmatprep.mubr.f32.mxu1 %v854_v17 }
  0xb2   :  { %v95_v26 = vpop.permute.xlu0 %94  ;;  %642 = vrot.lane.b32.xlu1 %v641_v22, %s847_s27  ;;  %637 = vrot.lane.b32.xlu0 %v636_v23, %s847_s27  ;;  %v97_v27 = vpop.permute.xlu1 %96 }
  0xb3   :  { %v103_v32 = vmul.f32 %v95_v26, %v940_v25  ;;  %v276_v33 = vmul.f32 %v938_v24, %v95_v26  ;;  %v99_v35 = vsel %vm98_vm1, %v95_v26, %v97_v27  ;;  %v105_v42 = vmul.f32 %v97_v27, %v932_v21 }
  0xb4   :  { %v104_v43 = vmul.f32 %v99_v35, %v930_v20  ;;  %v278_v50 = vmul.f32 %v928_v19, %v97_v27  ;;  %v277_v51 = vmul.f32 %v926_v18, %v99_v35 }
  0xb5   :  { %v681_v36 = vpack.i.bf16 %v276_v33, %v103_v32 }
  0xb6   :  { %652 = vrot.lane.b32.xlu1 %v636_v23, %s848_s28  ;;  %647 = vrot.lane.b32.xlu0 %v646_v28, %s847_s27  ;;  %v107_v29 = vpop.permute.xlu0 %106  ;;  %v109_v30 = vpop.permute.xlu1 %108  ;;  %v701_v55 = vpack.i.bf16 %v105_v42, %v104_v43  ;;  %v711_v62 = vpack.i.bf16 %v278_v50, %v277_v51  ;;  %v92_v43 = vmul.f32 %v940_v25, %v918_v13 }
  0xb7   :  { %v115_v37 = vmul.f32 %v107_v29, %v940_v25  ;;  %v279_v38 = vmul.f32 %v938_v24, %v107_v29  ;;  %v111_v48 = vsel %vm110_vm2, %v107_v29, %v109_v30  ;;  %v117_v52 = vmul.f32 %v109_v30, %v932_v21 }
  0xb8   :  { %v116_v53 = vmul.f32 %v111_v48, %v930_v20  ;;  %v281_v57 = vmul.f32 %v928_v19, %v109_v30  ;;  %v280_v58 = vmul.f32 %v926_v18, %v111_v48 }
  0xb9   :  { %v686_v46 = vpack.i.bf16 %v279_v38, %v115_v37 }
  0xba   :  { %657 = vrot.lane.b32.xlu1 %v641_v22, %s848_s28  ;;  %667 = vrot.lane.b32.xlu0 %v636_v23, %s849_s29  ;;  %v119_v31 = vpop.permute.xlu0 %118  ;;  %v121_v39 = vpop.permute.xlu1 %120  ;;  %v706_v61 = vpack.i.bf16 %v117_v52, %v116_v53  ;;  %v716_v1 = vpack.i.bf16 %v281_v57, %v280_v58 }
  0xbb   :  { %v127_v44 = vmul.f32 %v119_v31, %v940_v25  ;;  %v282_v45 = vmul.f32 %v938_v24, %v119_v31  ;;  %v123_v63 = vsel %vm122_vm4, %v119_v31, %v121_v39  ;;  %v129_v0 = vmul.f32 %v121_v39, %v932_v21 }
  0xbc   :  { %v128_v2 = vmul.f32 %v123_v63, %v930_v20  ;;  %v284_v8 = vmul.f32 %v928_v19, %v121_v39  ;;  %v283_v9 = vmul.f32 %v926_v18, %v123_v63 }
  0xbd   :  { %v691_v54 = vpack.i.bf16 %v282_v45, %v127_v44 }
  0xbe   :  { %662 = vrot.lane.b32.xlu1 %v646_v28, %s848_s28  ;;  %672 = vrot.lane.b32.xlu0 %v641_v22, %s849_s29  ;;  %v131_v34 = vpop.permute.xlu0 %130  ;;  %v133_v49 = vpop.permute.xlu1 %132  ;;  %v721_v10 = vpack.i.bf16 %v129_v0, %v128_v2  ;;  %v726_v15 = vpack.i.bf16 %v284_v8, %v283_v9 }
  0xbf   :  { %v139_v40 = vmul.f32 %v131_v34, %v940_v25  ;;  %v285_v41 = vmul.f32 %v938_v24, %v131_v34  ;;  %v135_v56 = vsel %vm134_vm3, %v131_v34, %v133_v49  ;;  %v141_v59 = vmul.f32 %v133_v49, %v932_v21 }
  0xc0   :  { %v140_v60 = vmul.f32 %v135_v56, %v930_v20  ;;  %v287_v3 = vmul.f32 %v928_v19, %v133_v49  ;;  %v286_v4 = vmul.f32 %v926_v18, %v135_v56  ;;  %v93_v34 = vmul.f32 %v930_v20, %v916_v12 }
  0xc1   :  { %v696_v47 = vpack.i.bf16 %v285_v41, %v139_v40 }
  0xc2   :  { %682 = vrot.lane.b32.xlu1 %v681_v36, %s850_s30  ;;  %677 = vrot.lane.b32.xlu0 %v646_v28, %s849_s29  ;;  %v731_v5 = vpack.i.bf16 %v141_v59, %v140_v60  ;;  %v145_v6 = vpop.permute.xlu1 %144  ;;  %v143_v7 = vpop.permute.xlu0 %142  ;;  %v736_v11 = vpack.i.bf16 %v287_v3, %v286_v4 }
  0xc3   :  { %v147_v14 = vsel %vm146_vm5, %v143_v7, %v145_v6  ;;  %v153_v22 = vmul.f32 %v145_v6, %v932_v21  ;;  %v290_v26 = vmul.f32 %v928_v19, %v145_v6  ;;  %v151_v27 = vmul.f32 %v143_v7, %v940_v25 }
  0xc4   :  { %v152_v16 = vmul.f32 %v147_v14, %v930_v20  ;;  %v289_v23 = vmul.f32 %v926_v18, %v147_v14  ;;  %v288_v28 = vmul.f32 %v938_v24, %v143_v7  ;;  %v275_v19 = vmul.f32 %v926_v18, %v916_v12 }
  0xc5   :  { %v274_v20 = vmul.f32 %v938_v24, %v918_v13 }
  0xc6   :  { %687 = vrot.lane.b32.xlu0 %v686_v46, %s851_s4  ;;  %697 = vrot.lane.b32.xlu1 %v696_v47, %s852_s5 }
  0xca   :  { %692 = vrot.lane.b32.xlu0 %v691_v54, %s853_s6  ;;  %702 = vrot.lane.b32.xlu1 %v701_v55, %s850_s30 }
  0xce   :  { %707 = vrot.lane.b32.xlu0 %v706_v61, %s851_s4  ;;  %712 = vrot.lane.b32.xlu1 %v711_v62, %s850_s30 }
  0xd2   :  { %717 = vrot.lane.b32.xlu0 %v716_v1, %s851_s4  ;;  %732 = vrot.lane.b32.xlu1 %v731_v5, %s852_s5 }
  0xd6   :  { %722 = vrot.lane.b32.xlu0 %v721_v10, %s853_s6  ;;  %737 = vrot.lane.b32.xlu1 %v736_v11, %s852_s5 }
  0xda   :  { %727 = vrot.lane.b32.xlu0 %v726_v15, %s853_s6  ;;  %250 = vrot.lane.b32.xlu1 %v152_v16, %s855_s7 }
  0xde   :  { %252 = vrot.lane.b32.xlu0 %v153_v22, %s855_s7  ;;  %380 = vrot.lane.b32.xlu1 %v289_v23, %s855_s7 }
  0xe2   :  { %382 = vrot.lane.b32.xlu0 %v290_v26, %s855_s7  ;;  %248 = vrot.lane.b32.xlu1 %v151_v27, %s855_s7 }
  0xe6   :  { %378 = vrot.lane.b32.xlu0 %v288_v28, %s855_s7 }
 0x124   :  { %v643_v29 = vpop.permute.xlu1 %642  ;;  %v638_v30 = vpop.permute.xlu0 %637 }
 0x125   :  { %v645_v31 = vunpack.i.h.bf16 %v643_v29  ;;  %v644_v32 = vunpack.i.l.bf16 %v643_v29  ;;  %v640_v33 = vunpack.i.h.bf16 %v638_v30  ;;  %v639_v21 = vunpack.i.l.bf16 %v638_v30 }
 0x127   :  { %v164_v35 = vsel %vm162_vm6, %v639_v21, %v640_v33  ;;  %v300_v36 = vsel %vm162_vm6, %v644_v32, %v645_v31 }
 0x128   :  { %v994_v37 = vpop.permute.xlu1 %652  ;;  %v648_v38 = vpop.permute.xlu0 %647  ;;  %v582_v39 = vpack.c.bf16 %v164_v35, %v93_v34  ;;  %v598_v40 = vpack.c.bf16 %v300_v36, %v275_v19 }
 0x129   :  { %v650_v41 = vunpack.i.h.bf16 %v648_v38  ;;  %v649_v42 = vunpack.i.l.bf16 %v648_v38  ;;  %v655_v61 = vunpack.i.h.bf16 %v994_v37  ;;  %v654_v62 = vunpack.i.l.bf16 %v994_v37 }
 0x12a   :  { %583 = vmatprep.subr.bf16.mxu0 %v582_v39  ;;  %599 = vmatprep.subr.bf16.mxu1 %v598_v40 }
 0x12b   :  { %v163_v12 = vsel %vm162_vm6, %v649_v42, %v639_v21  ;;  %v299_v18 = vsel %vm162_vm6, %v650_v41, %v644_v32  ;;  %v203_v27 = vsel %vm201_vm8, %v654_v62, %v655_v61 }
 0x12c   :  { %v1002_v44 = vpop.permute.xlu1 %657  ;;  %v1004_v45 = vpop.permute.xlu0 %667  ;;  %v584_v46 = vpack.c.bf16 %v163_v12, %v92_v43  ;;  %v600_v47 = vpack.c.bf16 %v299_v18, %v274_v20 }
 0x12d   :  { %v670_v5 = vunpack.i.h.bf16 %v1004_v45  ;;  %v669_v6 = vunpack.i.l.bf16 %v1004_v45  ;;  %v660_v32 = vunpack.i.h.bf16 %v1002_v44  ;;  %v659_v33 = vunpack.i.l.bf16 %v1002_v44 }
 0x12e   :  { %585 = vmatpush1.bf16.msra.mxu0 %v584_v46  ;;  %601 = vmatpush1.bf16.msra.mxu1 %v600_v47 }
 0x12f   :  { %v242_v39 = vsel %vm240_vm11, %v669_v6, %v670_v5 }
 0x130   :  { %v1006_v48 = vpop.permute.xlu1 %662  ;;  %v1008_v49 = vpop.permute.xlu0 %672 }
 0x131   :  { %v664_v22 = vunpack.i.l.bf16 %v1006_v48  ;;  %v665_v40 = vunpack.i.h.bf16 %v1006_v48  ;;  %v675_v41 = vunpack.i.h.bf16 %v1008_v49 }
 0x133   :  { %v202_v42 = vsel %vm201_vm8, %v664_v22, %v654_v62 }
 0x134   :  { %v683_v25 = vpop.permute.xlu1 %682  ;;  %v1010_v50 = vpop.permute.xlu0 %677 }
 0x135   :  { %v684_v55 = vunpack.i.l.bf16 %v683_v25  ;;  %v685_v11 = vunpack.i.h.bf16 %v683_v25  ;;  %v679_v46 = vunpack.i.l.bf16 %v1010_v50  ;;  %v680_v61 = vunpack.i.h.bf16 %v1010_v50 }
 0x138   :  { %v1012_v13 = vpop.permute.xlu1 %697  ;;  %v688_v24 = vpop.permute.xlu0 %687 }
 0x139   :  { %v689_v58 = vunpack.i.l.bf16 %v688_v24  ;;  %v690_v14 = vunpack.i.h.bf16 %v688_v24  ;;  %v699_v47 = vunpack.i.l.bf16 %v1012_v13 }
 0x13c   :  { %v703_v51 = vpop.permute.xlu1 %702  ;;  %v1014_v52 = vpop.permute.xlu0 %692 }
 0x13d   :  { %v705_v53 = vunpack.i.h.bf16 %v703_v51  ;;  %v704_v54 = vunpack.i.l.bf16 %v703_v51  ;;  %v694_v36 = vunpack.i.l.bf16 %v1014_v52 }
 0x13f   :  { %v178_v63 = vsel %vm176_vm7, %v704_v54, %v705_v53  ;;  %v177_v0 = vsel %vm176_vm7, %v684_v55, %v704_v54  ;;  %v674_v53 = vunpack.i.l.bf16 %v1008_v49  ;;  %v695_v54 = vunpack.i.h.bf16 %v1014_v52 }
 0x140   :  { %v713_v56 = vpop.permute.xlu1 %712  ;;  %v708_v57 = vpop.permute.xlu0 %707  ;;  %v700_v52 = vunpack.i.h.bf16 %v1012_v13 }
 0x141   :  { %v710_v59 = vunpack.i.h.bf16 %v708_v57  ;;  %v709_v60 = vunpack.i.l.bf16 %v708_v57  ;;  %v715_v1 = vunpack.i.h.bf16 %v713_v56  ;;  %v714_v2 = vunpack.i.l.bf16 %v713_v56 }
 0x142   :  { %v372_v50 = vsel %vm240_vm11, %v674_v53, %v675_v41  ;;  %v371_v45 = vsel %vm240_vm11, %v680_v61, %v674_v53 }
 0x143   :  { %v192_v3 = vsel %vm190_vm9, %v709_v60, %v710_v59  ;;  %v191_v4 = vsel %vm190_vm9, %v689_v58, %v709_v60  ;;  %v313_v28 = vsel %vm176_vm7, %v714_v2, %v715_v1  ;;  %v312_v30 = vsel %vm176_vm7, %v685_v11, %v714_v2 }
 0x144   :  { %v733_v7 = vpop.permute.xlu1 %732  ;;  %v718_v8 = vpop.permute.xlu0 %717  ;;  %v586_v9 = vpack.c.bf16 %v192_v3, %v178_v63  ;;  %v588_v10 = vpack.c.bf16 %v191_v4, %v177_v0  ;;  %v336_v58 = vsel %vm201_vm8, %v659_v33, %v660_v32  ;;  %v335_v60 = vsel %vm201_vm8, %v665_v40, %v659_v33 }
 0x145   :  { %v720_v15 = vunpack.i.h.bf16 %v718_v8  ;;  %v719_v16 = vunpack.i.l.bf16 %v718_v8  ;;  %v735_v23 = vunpack.i.h.bf16 %v733_v7  ;;  %v734_v26 = vunpack.i.l.bf16 %v733_v7 }
 0x146   :  { %587 = vmatprep.subr.bf16.mxu0 %v586_v9  ;;  %v241_v3 = vsel %vm240_vm11, %v679_v46, %v669_v6 }
 0x147   :  { %589 = vmatpush1.bf16.msra.mxu0 %v588_v10  ;;  %v326_v29 = vsel %vm190_vm9, %v719_v16, %v720_v15  ;;  %v325_v31 = vsel %vm190_vm9, %v690_v14, %v719_v16  ;;  %v231_v43 = vsel %vm229_vm10, %v734_v26, %v735_v23  ;;  %v230_v59 = vsel %vm229_vm10, %v699_v47, %v734_v26  ;;  %v388_v14 = vld [vmem:[#allocation5] sm:$0xff]  ;;  %v389_v23 = vld [vmem:[#allocation5 + $0x8] sm:$0xff] }
 0x148   :  { %v738_v21 = vpop.permute.xlu1 %737  ;;  %v723_v34 = vpop.permute.xlu0 %722  ;;  %v602_v19 = vpack.c.bf16 %v326_v29, %v313_v28  ;;  %v604_v35 = vpack.c.bf16 %v325_v31, %v312_v30  ;;  %v594_v57 = vpack.c.bf16 %v242_v39, %v231_v43  ;;  %v596_v5 = vpack.c.bf16 %v241_v3, %v230_v59 }
 0x149   :  { %v725_v37 = vunpack.i.h.bf16 %v723_v34  ;;  %v724_v38 = vunpack.i.l.bf16 %v723_v34  ;;  %v740_v20 = vunpack.i.h.bf16 %v738_v21  ;;  %v739_v12 = vunpack.i.l.bf16 %v738_v21 }
 0x14a   :  { %603 = vmatprep.subr.bf16.mxu1 %v602_v19 }
 0x14b   :  { %605 = vmatpush1.bf16.msra.mxu1 %v604_v35  ;;  %v217_v18 = vsel %vm215_vm12, %v724_v38, %v725_v37  ;;  %v216_v44 = vsel %vm215_vm12, %v694_v36, %v724_v38  ;;  %v362_v49 = vsel %vm229_vm10, %v739_v12, %v740_v20  ;;  %v361_v8 = vsel %vm229_vm10, %v700_v52, %v739_v12 }
 0x14c   :  { %v251_v25 = vpop.permute.xlu1 %250  ;;  %v728_v48 = vpop.permute.xlu0 %727  ;;  %v590_v24 = vpack.c.bf16 %v217_v18, %v203_v27  ;;  %v592_v51 = vpack.c.bf16 %v216_v44, %v202_v42  ;;  %v610_v7 = vpack.c.bf16 %v372_v50, %v362_v49  ;;  %v612_v11 = vpack.c.bf16 %v371_v45, %v361_v8 }
 0x14d   :  { %v730_v55 = vunpack.i.h.bf16 %v728_v48  ;;  %v729_v56 = vunpack.i.l.bf16 %v728_v48 }
 0x14e   :  { %591 = vmatprep.subr.bf16.mxu0 %v590_v24 }
 0x14f   :  { %593 = vmatpush1.bf16.msra.mxu0 %v592_v51  ;;  %v349_v62 = vsel %vm215_vm12, %v729_v56, %v730_v55  ;;  %v348_v63 = vsel %vm215_vm12, %v695_v54, %v729_v56 }
 0x150   :  { %v381_v0 = vpop.permute.xlu1 %380  ;;  %v253_v1 = vpop.permute.xlu0 %252  ;;  %595 = vmatprep.subr.bf16.mxu0 %v594_v57  ;;  %v606_v2 = vpack.c.bf16 %v349_v62, %v336_v58  ;;  %v608_v4 = vpack.c.bf16 %v348_v63, %v335_v60 }
 0x151   :  { %v256_v13 = vsel %vm254_vm13, %v251_v25, %v253_v1 }
 0x152   :  { %607 = vmatprep.subr.bf16.mxu1 %v606_v2 }
 0x153   :  { %597 = vmatpush1.bf16.msra.mxu0 %v596_v5  ;;  %609 = vmatpush1.bf16.msra.mxu1 %v608_v4 }
 0x154   :  { %v249_v9 = vpop.permute.xlu1 %248  ;;  %v383_v10 = vpop.permute.xlu0 %382  ;;  %413 = vmatprep.subr.mxu0 %v256_v13  ;;  %611 = vmatprep.subr.bf16.mxu1 %v610_v7 }
 0x155   :  { %v255_v6 = vsel %vm254_vm13, %v249_v9, %v251_v25  ;;  %v385_v15 = vsel %vm254_vm13, %v381_v0, %v383_v10 }
 0x157   :  { %414 = vmatpush1.msra.mxu0 %v255_v6  ;;  %613 = vmatpush1.bf16.msra.mxu1 %v612_v11 }
 0x158   :  { %v379_v16 = vpop.permute.xlu0 %378  ;;  %490 = vmatprep.subr.mxu1 %v385_v15  ;;  %578 = vmatmul.mubr.msk.f32.vlgmr.msra.gmra.mrb[0].mxu0 %vm390_vm14, %v388_v14 }
 0x159   :  { %v384_v22 = vsel %vm254_vm13, %v379_v16, %v381_v0  ;;  %467 = vmatprep.mubr.f32.mxu0 %v854_v17 }
 0x15b   :  { %491 = vmatpush1.msra.mxu1 %v384_v22 }
 0x15c   :  { %580 = vmatmul.mubr.msk.f32.vlgmr.msra.gmra.mrb[0].mxu1 %vm390_vm14, %v388_v14  ;;  %579 = vmatmul.mubr.msk.f32.gmra.mrb[2].mxu0 %vm390_vm14, %v389_v23 }
 0x15d   :  { %544 = vmatprep.mubr.f32.mxu1 %v854_v17 }
 0x160   :  { %581 = vmatmul.mubr.msk.f32.gmra.mrb[2].mxu1 %vm390_vm14, %v389_v23 }
 0x22b   :  { %v463_v26 = vpop.f32.mrb[0].mxu0 }
 0x22c   :  { %551 = vst [vmem:[#allocation8] sm:$0xff] %v463_v26  ;;  %v465_v27 = vpop.f32.mrb[1].mxu0 }
 0x22d   :  { %552 = vst [vmem:[#allocation8 + $0x8] sm:$0xff] %v465_v27 }
 0x22f   :  { %v540_v28 = vpop.f32.mrb[0].mxu1  ;;  %v469_v29 = vpop.f32.mrb[2].mxu0 }
 0x230   :  { %556 = vst [vmem:[#allocation8 + $0x20] sm:$0xff] %v540_v28  ;;  %v542_v30 = vpop.f32.mrb[1].mxu1  ;;  %553 = vst [vmem:[#allocation8 + $0x10] sm:$0xff] %v469_v29  ;;  %v471_v31 = vpop.f32.mrb[3].mxu0 }
 0x231   :  { %557 = vst [vmem:[#allocation8 + $0x28] sm:$0xff] %v542_v30  ;;  %554 = vst [vmem:[#allocation8 + $0x18] sm:$0xff] %v471_v31 }
 0x233   :  { %v546_v32 = vpop.f32.mrb[2].mxu1 }
 0x234   :  { %558 = vst [vmem:[#allocation8 + $0x30] sm:$0xff] %v546_v32  ;;  %v548_v33 = vpop.f32.mrb[3].mxu1 }
 0x235   :  { %559 = vst [vmem:[#allocation8 + $0x38] sm:$0xff] %v548_v33 }
 0x236   :  { %818 = shalt.err (!%p815_p0)
}
 0x237   :  { %s819_s14 = scalar_lea.hbm %s1084_s3, 1024 }
 0x238   :  { %p820_p1 = scmp.ne.s32.totalorder %s1084_s3, %s819_s14  ;;  %p823_p2 = scmp.lt.u32.totalorder %s819_s14, %s1084_s3 }
 0x23a   :  { %p825_p3 = pnand %p823_p2, %p820_p1 }
 0x23c   :  { %828 = shalt.err (!%p825_p3)
}
 0x23d   :  { %571 = dma.vmem_to_hbm [thread:$0]  %s566_s10, 1024, %s1084_s3, [#allocation4], %s839_s1, %s839_s1, %s840_s9  }
 0x23e   :  { %833 = dma.done.wait [#allocation4], 1024  }
 0x23f   :  { %834 = vsyncadd [#allocation4], 4294966272 }
 0x240   :  { %575 = vsyncpa [#allocation3], 1 }
 0x241   :  { %576 = vsyncpa [#allocation6], 1 }
 0x242   :  { %577 = vsyncpa [#allocation4], 1 }

</bundles_post_ra>
